<compile_context>
chip_gen: v7x
topology: tpu7x:2x2x1
jax: 0.10.0
libtpu: 0.0.40
codegen_flags: <defaults>
</compile_context>

<pallas_src>
import functools

import jax
import jax.numpy as jnp
from jax.experimental import pallas as pl
from jax.experimental.pallas import tpu as pltpu

_LANE = 128
_SUBLANE = 8
_MAX_TILE_ROWS = 8192                     # 8192*128*4 B = 4 MiB / input / buffer
_VMEM_LIMIT_BYTES = 32 * 1024 * 1024      # covers v5e's 16 MiB scoped default


def _round_up(a, b):
    return (a + b - 1) // b * b


def _pearson_kernel(x_ref, y_ref, o_ref, stat,
                    *, num_tiles, tile_elems, last_n):
    """Single HBM pass.

    Per tile: centre x/y around the tile's own mean, reduce to scalar partial
    moments, and merge into the running state
        stat = [n, mean_x, mean_y, Cxy, Cxx, Cyy]   (SMEM, f32)
    with Chan's parallel-combine formula.
    """
    i = pl.program_id(0)
    last = num_tiles - 1
    zero = jnp.float32(0.0)

    @pl.when(i == 0)
    def _init():
        for k in range(6):
            stat[k] = zero

    x = x_ref[...].astype(jnp.float32)
    y = y_ref[...].astype(jnp.float32)

    def tile_stats(mask, n_t):
        # Partial moments of this tile, centred at the tile's own mean.
        if mask is None:
            xs, ys = x, y
        else:
            xs = jnp.where(mask, x, 0.0)
            ys = jnp.where(mask, y, 0.0)
        inv_n = 1.0 / n_t
        mx = jnp.sum(xs) * inv_n
        my = jnp.sum(ys) * inv_n
        vx = x - mx
        vy = y - my
        if mask is not None:
            # Zero the pad / out-of-bounds lanes (their contents are garbage).
            vx = jnp.where(mask, vx, 0.0)
            vy = jnp.where(mask, vy, 0.0)
        return (mx, my,
                jnp.sum(vx * vy), jnp.sum(vx * vx), jnp.sum(vy * vy))

    def combine(n_t, mx, my, cxy, cxx, cyy):
        # Chan parallel combine of (state) with this tile's statistics.
        nA, mxA, myA = stat[0], stat[1], stat[2]
        n = nA + n_t
        dx = mx - mxA
        dy = my - myA
        w = nA * (n_t / n)                 # = nA*nB/(nA+nB); 0 on the first tile
        stat[3] = stat[3] + cxy + dx * dy * w
        stat[4] = stat[4] + cxx + dx * dx * w
        stat[5] = stat[5] + cyy + dy * dy * w
        r = n_t / n
        stat[1] = mxA + dx * r
        stat[2] = myA + dy * r
        stat[0] = n

    if last_n == tile_elems:
        # Every tile is completely valid: no masking anywhere.
        combine(float(tile_elems), *tile_stats(None, float(tile_elems)))
    else:
        @pl.when(i < last)
        def _full_tiles():
            combine(float(tile_elems), *tile_stats(None, float(tile_elems)))

        @pl.when(i == last)
        def _tail_tile():
            rid = jax.lax.broadcasted_iota(jnp.int32, x.shape, 0)
            lid = jax.lax.broadcasted_iota(jnp.int32, x.shape, 1)
            mask = rid * _LANE + lid < last_n
            combine(float(last_n), *tile_stats(mask, float(last_n)))

    @pl.when(i == last)
    def _finalize():
        # Same formula (and same NaN behaviour for constant inputs) as the
        # PyTorch reference.
        o_ref[0, 0] = stat[3] / (jnp.sqrt(stat[4]) * jnp.sqrt(stat[5]))


def pearson_correlation(y_pred, y_true):
    """Pearson correlation coefficient over all elements (scalar, float32)."""
    assert y_pred.shape == y_true.shape, "inputs must have identical shapes"
    total = int(y_pred.size)
    assert total > 0
    # Element indexing / tile bookkeeping uses int32: supports < 2**31 elements.

    rows = pl.cdiv(total, _LANE)
    padded_rows = _round_up(rows, _SUBLANE)
    tile_rows = min(_MAX_TILE_ROWS, padded_rows)          # multiple of 8
    num_tiles = pl.cdiv(padded_rows, tile_rows)
    tile_elems = tile_rows * _LANE
    last_n = total - (num_tiles - 1) * tile_elems          # valid elems in last tile (>= 1)
    pad = padded_rows * _LANE - total                      # < 1024 elements

    def _prep(a):
        flat = a.reshape(-1)
        if pad:
            # Tiny tail pad (< 1024 elements), only when total is not a
            # multiple of 1024; masked out again inside the kernel.
            # TODO(synk): for huge ragged inputs this still copies the array
            # once — a manual-DMA tail path would avoid it entirely.
            flat = jnp.pad(flat, (0, pad))
        return flat.reshape(padded_rows, _LANE)

    kernel = functools.partial(
        _pearson_kernel,
        num_tiles=int(num_tiles), tile_elems=tile_elems, last_n=last_n)

    bytes_accessed = total * (y_pred.dtype.itemsize + y_true.dtype.itemsize) + 4
    cost = pl.CostEstimate(flops=12 * total, transcendentals=0,
                           bytes_accessed=bytes_accessed)

    out = pl.pallas_call(
        kernel,
        out_shape=jax.ShapeDtypeStruct((1, 1), jnp.float32),
        grid=(int(num_tiles),),
        in_specs=[
            pl.BlockSpec((tile_rows, _LANE), lambda i: (i, 0)),
            pl.BlockSpec((tile_rows, _LANE), lambda i: (i, 0)),
        ],
        out_specs=pl.BlockSpec((1, 1), lambda i: (0, 0),
                               memory_space=pltpu.MemorySpace.SMEM),
        scratch_shapes=[
            pltpu.SMEM((6,), jnp.float32),   # (n, mean_x, mean_y, Cxy, Cxx, Cyy)
        ],
        compiler_params=pltpu.CompilerParams(
            # Single sequential reduction axis (state carried in SMEM scratch).
            dimension_semantics=("arbitrary",),
            vmem_limit_bytes=_VMEM_LIMIT_BYTES),
        cost_estimate=cost,
    )(_prep(y_pred), _prep(y_true))

    # cost.mean() on a 0-d tensor is a no-op; return the scalar.
    return out[0, 0]


def _reference(y_pred, y_true):
    vx = y_pred - jnp.mean(y_pred)
    vy = y_true - jnp.mean(y_true)
    return jnp.sum(vx * vy) / (jnp.sqrt(jnp.sum(vx ** 2)) * jnp.sqrt(jnp.sum(vy ** 2)))


if __name__ == "__main__":
    key = jax.random.PRNGKey(0)
    k1, k2, k3, k4 = jax.random.split(key, 4)

    # Case 1: batch=2, channels=4, 16x16 spatial (NCHW) — lane-aligned size,
    # no padding, single full tile.
    y_pred = jax.random.normal(k1, (2, 4, 16, 16), dtype=jnp.float32)
    y_true = 0.7 * y_pred + 0.3 * jax.random.normal(k2, (2, 4, 16, 16), jnp.float32)
    loss = pearson_correlation(y_pred, y_true)
    jax.block_until_ready(loss)
    ref = _reference(y_pred, y_true)
    assert jnp.allclose(loss, ref, rtol=1e-5, atol=1e-6), (loss, ref)

    # Case 2: ragged size with nonzero mean (exercises the small tail pad and
    # the in-kernel iota mask on the last tile).
    y_pred2 = 2.5 + jax.random.normal(k3, (2, 3, 17, 19), dtype=jnp.float32)
    y_true2 = 0.5 * y_pred2 + 0.5 * jax.random.normal(k4, (2, 3, 17, 19), jnp.float32)
    loss2 = pearson_correlation(y_pred2, y_true2)
    jax.block_until_ready(loss2)
    ref2 = _reference(y_pred2, y_true2)
    assert jnp.allclose(loss2, ref2, rtol=1e-5, atol=1e-6), (loss2, ref2)

    print("KERNEL_OK")
</pallas_src>

<mosaic_0001>
module attributes {stable_mosaic.version = 11 : i64} {
  func.func @_pearson_kernel(%arg0: i32, %arg1: memref<16x128xf32, #tpu.memory_space<vmem>>, %arg2: memref<16x128xf32, #tpu.memory_space<vmem>>, %arg3: memref<1x1xf32, #tpu.memory_space<smem>>, %arg4: memref<6xf32, #tpu.memory_space<smem>>) attributes {dimension_semantics = [#tpu.dimension_semantics<arbitrary>], iteration_bounds = array<i64: 1>, scalar_prefetch = 0 : i64, scratch_operands = 1 : i64, tpu.core_type = #tpu.core_type<tc>, window_params = [{transform_indices = @transform_0, window_bounds = array<i64: 16, 128>}, {transform_indices = @transform_1, window_bounds = array<i64: 16, 128>}, {transform_indices = @transform_2, window_bounds = array<i64: 1, 1>}]} {
    %c0_i32 = arith.constant 0 : i32
    %0 = arith.cmpi eq, %arg0, %c0_i32 : i32
    %1 = arith.extui %0 : i1 to i32
    %cst = arith.constant 0.000000e+00 : f32
    %c0_i32_0 = arith.constant 0 : i32
    %2 = arith.cmpi ne, %1, %c0_i32_0 : i32
    scf.if %2 {
      %c0_23 = arith.constant 0 : index
      %71 = memref.load %arg4[%c0_23] : memref<6xf32, #tpu.memory_space<smem>>
      memref.store %cst, %arg4[%c0_23] : memref<6xf32, #tpu.memory_space<smem>>
      %c1_24 = arith.constant 1 : index
      %72 = memref.load %arg4[%c1_24] : memref<6xf32, #tpu.memory_space<smem>>
      memref.store %cst, %arg4[%c1_24] : memref<6xf32, #tpu.memory_space<smem>>
      %c2_25 = arith.constant 2 : index
      %73 = memref.load %arg4[%c2_25] : memref<6xf32, #tpu.memory_space<smem>>
      memref.store %cst, %arg4[%c2_25] : memref<6xf32, #tpu.memory_space<smem>>
      %c3_26 = arith.constant 3 : index
      %74 = memref.load %arg4[%c3_26] : memref<6xf32, #tpu.memory_space<smem>>
      memref.store %cst, %arg4[%c3_26] : memref<6xf32, #tpu.memory_space<smem>>
      %c4_27 = arith.constant 4 : index
      %75 = memref.load %arg4[%c4_27] : memref<6xf32, #tpu.memory_space<smem>>
      memref.store %cst, %arg4[%c4_27] : memref<6xf32, #tpu.memory_space<smem>>
      %c5_28 = arith.constant 5 : index
      %76 = memref.load %arg4[%c5_28] : memref<6xf32, #tpu.memory_space<smem>>
      memref.store %cst, %arg4[%c5_28] : memref<6xf32, #tpu.memory_space<smem>>
    } else {
    }
    %c0 = arith.constant 0 : index
    %c0_1 = arith.constant 0 : index
    %3 = vector.load %arg1[%c0, %c0_1] : memref<16x128xf32, #tpu.memory_space<vmem>>, vector<16x128xf32>
    %c0_2 = arith.constant 0 : index
    %c0_3 = arith.constant 0 : index
    %4 = vector.load %arg2[%c0_2, %c0_3] : memref<16x128xf32, #tpu.memory_space<vmem>>, vector<16x128xf32>
    %5 = vector.shape_cast %3 : vector<16x128xf32> to vector<1x16x128xf32>
    %cst_4 = arith.constant dense<0.000000e+00> : vector<1xf32>
    %6 = vector.multi_reduction <add>, %5, %cst_4 [1, 2] : vector<1x16x128xf32> to vector<1xf32>
    %7 = vector.shape_cast %6 : vector<1xf32> to vector<1x1x1xf32>
    %8 = vector.extract %7[0, 0, 0] : f32 from vector<1x1x1xf32>
    %cst_5 = arith.constant 4.8828125E-4 : f32
    %9 = arith.mulf %8, %cst_5 : f32
    %10 = vector.shape_cast %4 : vector<16x128xf32> to vector<1x16x128xf32>
    %cst_6 = arith.constant dense<0.000000e+00> : vector<1xf32>
    %11 = vector.multi_reduction <add>, %10, %cst_6 [1, 2] : vector<1x16x128xf32> to vector<1xf32>
    %12 = vector.shape_cast %11 : vector<1xf32> to vector<1x1x1xf32>
    %13 = vector.extract %12[0, 0, 0] : f32 from vector<1x1x1xf32>
    %cst_7 = arith.constant 4.8828125E-4 : f32
    %14 = arith.mulf %13, %cst_7 : f32
    %15 = vector.broadcast %9 : f32 to vector<16x128xf32>
    %16 = arith.subf %3, %15 : vector<16x128xf32>
    %17 = vector.broadcast %14 : f32 to vector<16x128xf32>
    %18 = arith.subf %4, %17 : vector<16x128xf32>
    %19 = arith.mulf %16, %18 : vector<16x128xf32>
    %20 = vector.shape_cast %19 : vector<16x128xf32> to vector<1x16x128xf32>
    %cst_8 = arith.constant dense<0.000000e+00> : vector<1xf32>
    %21 = vector.multi_reduction <add>, %20, %cst_8 [1, 2] : vector<1x16x128xf32> to vector<1xf32>
    %22 = vector.shape_cast %21 : vector<1xf32> to vector<1x1x1xf32>
    %23 = vector.extract %22[0, 0, 0] : f32 from vector<1x1x1xf32>
    %24 = arith.mulf %16, %16 : vector<16x128xf32>
    %25 = vector.shape_cast %24 : vector<16x128xf32> to vector<1x16x128xf32>
    %cst_9 = arith.constant dense<0.000000e+00> : vector<1xf32>
    %26 = vector.multi_reduction <add>, %25, %cst_9 [1, 2] : vector<1x16x128xf32> to vector<1xf32>
    %27 = vector.shape_cast %26 : vector<1xf32> to vector<1x1x1xf32>
    %28 = vector.extract %27[0, 0, 0] : f32 from vector<1x1x1xf32>
    %29 = arith.mulf %18, %18 : vector<16x128xf32>
    %30 = vector.shape_cast %29 : vector<16x128xf32> to vector<1x16x128xf32>
    %cst_10 = arith.constant dense<0.000000e+00> : vector<1xf32>
    %31 = vector.multi_reduction <add>, %30, %cst_10 [1, 2] : vector<1x16x128xf32> to vector<1xf32>
    %32 = vector.shape_cast %31 : vector<1xf32> to vector<1x1x1xf32>
    %33 = vector.extract %32[0, 0, 0] : f32 from vector<1x1x1xf32>
    %c0_11 = arith.constant 0 : index
    %34 = memref.load %arg4[%c0_11] : memref<6xf32, #tpu.memory_space<smem>>
    %c1 = arith.constant 1 : index
    %35 = memref.load %arg4[%c1] : memref<6xf32, #tpu.memory_space<smem>>
    %c2 = arith.constant 2 : index
    %36 = memref.load %arg4[%c2] : memref<6xf32, #tpu.memory_space<smem>>
    %cst_12 = arith.constant 2.048000e+03 : f32
    %37 = arith.addf %34, %cst_12 : f32
    %38 = arith.subf %9, %35 : f32
    %39 = arith.subf %14, %36 : f32
    %cst_13 = arith.constant 2.048000e+03 : f32
    %40 = arith.divf %cst_13, %37 : f32
    %41 = arith.mulf %34, %40 : f32
    %c3 = arith.constant 3 : index
    %42 = memref.load %arg4[%c3] : memref<6xf32, #tpu.memory_space<smem>>
    %43 = arith.addf %42, %23 : f32
    %44 = arith.mulf %38, %39 : f32
    %45 = arith.mulf %44, %41 : f32
    %46 = arith.addf %43, %45 : f32
    %c3_14 = arith.constant 3 : index
    %47 = memref.load %arg4[%c3_14] : memref<6xf32, #tpu.memory_space<smem>>
    memref.store %46, %arg4[%c3_14] : memref<6xf32, #tpu.memory_space<smem>>
    %c4 = arith.constant 4 : index
    %48 = memref.load %arg4[%c4] : memref<6xf32, #tpu.memory_space<smem>>
    %49 = arith.addf %48, %28 : f32
    %50 = arith.mulf %38, %38 : f32
    %51 = arith.mulf %50, %41 : f32
    %52 = arith.addf %49, %51 : f32
    %c4_15 = arith.constant 4 : index
    %53 = memref.load %arg4[%c4_15] : memref<6xf32, #tpu.memory_space<smem>>
    memref.store %52, %arg4[%c4_15] : memref<6xf32, #tpu.memory_space<smem>>
    %c5 = arith.constant 5 : index
    %54 = memref.load %arg4[%c5] : memref<6xf32, #tpu.memory_space<smem>>
    %55 = arith.addf %54, %33 : f32
    %56 = arith.mulf %39, %39 : f32
    %57 = arith.mulf %56, %41 : f32
    %58 = arith.addf %55, %57 : f32
    %c5_16 = arith.constant 5 : index
    %59 = memref.load %arg4[%c5_16] : memref<6xf32, #tpu.memory_space<smem>>
    memref.store %58, %arg4[%c5_16] : memref<6xf32, #tpu.memory_space<smem>>
    %cst_17 = arith.constant 2.048000e+03 : f32
    %60 = arith.divf %cst_17, %37 : f32
    %61 = arith.mulf %38, %60 : f32
    %62 = arith.addf %35, %61 : f32
    %c1_18 = arith.constant 1 : index
    %63 = memref.load %arg4[%c1_18] : memref<6xf32, #tpu.memory_space<smem>>
    memref.store %62, %arg4[%c1_18] : memref<6xf32, #tpu.memory_space<smem>>
    %64 = arith.mulf %39, %60 : f32
    %65 = arith.addf %36, %64 : f32
    %c2_19 = arith.constant 2 : index
    %66 = memref.load %arg4[%c2_19] : memref<6xf32, #tpu.memory_space<smem>>
    memref.store %65, %arg4[%c2_19] : memref<6xf32, #tpu.memory_space<smem>>
    %c0_20 = arith.constant 0 : index
    %67 = memref.load %arg4[%c0_20] : memref<6xf32, #tpu.memory_space<smem>>
    memref.store %37, %arg4[%c0_20] : memref<6xf32, #tpu.memory_space<smem>>
    %c0_i32_21 = arith.constant 0 : i32
    %68 = arith.cmpi eq, %arg0, %c0_i32_21 : i32
    %69 = arith.extui %68 : i1 to i32
    %c0_i32_22 = arith.constant 0 : i32
    %70 = arith.cmpi ne, %69, %c0_i32_22 : i32
    scf.if %70 {
      %c3_23 = arith.constant 3 : index
      %71 = memref.load %arg4[%c3_23] : memref<6xf32, #tpu.memory_space<smem>>
      %c4_24 = arith.constant 4 : index
      %72 = memref.load %arg4[%c4_24] : memref<6xf32, #tpu.memory_space<smem>>
      %73 = math.sqrt %72 : f32
      %c5_25 = arith.constant 5 : index
      %74 = memref.load %arg4[%c5_25] : memref<6xf32, #tpu.memory_space<smem>>
      %75 = math.sqrt %74 : f32
      %76 = arith.mulf %73, %75 : f32
      %77 = arith.divf %71, %76 : f32
      %c0_26 = arith.constant 0 : index
      %c0_27 = arith.constant 0 : index
      %78 = memref.load %arg3[%c0_26, %c0_27] : memref<1x1xf32, #tpu.memory_space<smem>>
      memref.store %77, %arg3[%c0_26, %c0_27] : memref<1x1xf32, #tpu.memory_space<smem>>
    } else {
    }
    return
  }
  func.func @transform_0(%arg0: i32) -> (i32, i32) {
    %c0_i32 = arith.constant 0 : i32
    %c0_i32_0 = arith.constant 0 : i32
    return %arg0, %c0_i32 : i32, i32
  }
  func.func @transform_1(%arg0: i32) -> (i32, i32) {
    %c0_i32 = arith.constant 0 : i32
    %c0_i32_0 = arith.constant 0 : i32
    return %arg0, %c0_i32 : i32, i32
  }
  func.func @transform_2(%arg0: i32) -> (i32, i32) {
    %c0_i32 = arith.constant 0 : i32
    %c0_i32_0 = arith.constant 0 : i32
    %c0_i32_1 = arith.constant 0 : i32
    return %c0_i32, %c0_i32_0 : i32, i32
  }
}

</mosaic_0001>

<bundles_post_ra>
// kernel: tpu_custom_call.1
= control target key start
LH: loop header
LB: loop body
LE: loop exit
PB: predicated region body
PF: predicated region fallthrough
CT: control target
= control target key end

     0   :  { %7 = vsyncpa [#allocation4], 0  ;;  %s387_s0 = inlined_call_operand.hbm [shape: f32[16,128], index: 0, kind: input, shape index: {}]   ;;  %s388_s1 = inlined_call_operand.hbm [shape: f32[16,128], index: 1, kind: input, shape index: {}]   ;;  %s389_s2 = inlined_call_operand.hbm [shape: f32[1,1], index: 2, kind: output, shape index: {}]  }
   0x1   :  { %8 = vsyncpa [#allocation7], 0 }
   0x2   :  { %9 = vsyncpa [#allocation5], 0  ;;  %s307_s9 = smov [#allocation3]   ;;  %s247_s13 = scalar_lea.hbm %s387_s0, 256 }
   0x3   :  { %s15_s10 = sshll.u32 %s307_s9, 4  ;;  %p248_p0 = scmp.ne.s32.totalorder %s387_s0, %s247_s13  ;;  %s16_s10 = int_to_ptr.vmem [resolvable:$true] %s15_s10 }
   0x4   :  { %p251_p1 = scmp.lt.u32.totalorder %s247_s13, %s387_s0 }
   0x6   :  { %p253_p2 = pnand %p251_p1, %p248_p0 }
   0x8   :  { %256 = shalt.err (!%p253_p2)
}
   0x9   :  { %s257_s18 = scalar_lea.vmem %s16_s10, 256  ;;  %p262_p4 = scmp.lt.s32.totalorder %s16_s10, %s16_s10 }
   0xa   :  { %p258_p3 = scmp.ne.s32.totalorder %s16_s10, %s257_s18  ;;  %p263_p5 = scmp.lt.s32.totalorder %s257_s18, %s257_s18 }
   0xc   :  { %p264_p6 = por %p263_p5, %p262_p4 }
   0xe   :  { %p265_p7 = pnand %p264_p6, %p258_p3 }
  0x10   :  { %268 = shalt.err (!%p265_p7)
}
  0x11   :  { %s308_s19 = smov 128   ;;  %s309_s20 = smov 8  }
  0x12   :  { %21 = dma.hbm_to_vmem [thread:$0]  %s387_s0, 256, %s16_s10, [#allocation4], %s308_s19, %s308_s19, %s309_s20  }
  0x13   :  { %s310_s23 = smov [#allocation6]   ;;  %s269_s27 = scalar_lea.hbm %s388_s1, 256 }
  0x14   :  { %s27_s24 = sshll.u32 %s310_s23, 4  ;;  %p270_p8 = scmp.ne.s32.totalorder %s388_s1, %s269_s27  ;;  %s28_s24 = int_to_ptr.vmem [resolvable:$true] %s27_s24 }
  0x15   :  { %p273_p9 = scmp.lt.u32.totalorder %s269_s27, %s388_s1 }
  0x17   :  { %p275_p10 = pnand %p273_p9, %p270_p8 }
  0x19   :  { %278 = shalt.err (!%p275_p10)
}
  0x1a   :  { %s279_s4 = scalar_lea.vmem %s28_s24, 256  ;;  %p284_p12 = scmp.lt.s32.totalorder %s28_s24, %s28_s24 }
  0x1b   :  { %p280_p11 = scmp.ne.s32.totalorder %s28_s24, %s279_s4  ;;  %p285_p13 = scmp.lt.s32.totalorder %s279_s4, %s279_s4 }
  0x1d   :  { %p286_p0 = por %p285_p13, %p284_p12 }
  0x1f   :  { %p287_p1 = pnand %p286_p0, %p280_p11 }
  0x21   :  { %290 = shalt.err (!%p287_p1)
}
  0x22   :  { %33 = dma.hbm_to_vmem [thread:$0]  %s388_s1, 256, %s28_s24, [#allocation7], %s308_s19, %s308_s19, %s309_s20  }
  0x23   :  { %301 = dma.done.wait [#allocation4], 256  }
  0x24   :  { %302 = vsyncadd [#allocation4], 4294967040 }
  0x25   :  { %303 = dma.done.wait [#allocation7], 256  }
  0x26   :  { %304 = vsyncadd [#allocation7], 4294967040  ;;  %v56_v0 = vld [vmem:[#allocation3] sm:$0xff]  ;;  %v57_v1 = vld [vmem:[#allocation3 + $0x8] sm:$0xff]  ;;  %s291_s28 = scalar_lea.hbm %s389_s2, 16 }
  0x27   :  { %v58_v2 = vld [vmem:[#allocation6] sm:$0xff]  ;;  %v60_v3 = vadd.f32 %v57_v1, %v56_v0  ;;  %v59_v4 = vld [vmem:[#allocation6 + $0x8] sm:$0xff]  ;;  %p292_p2 = scmp.ne.s32.totalorder %s389_s2, %s291_s28  ;;  %p295_p3 = scmp.lt.u32.totalorder %s291_s28, %s389_s2 }
  0x28   :  { %v71_v5 = vadd.f32 %v59_v4, %v58_v2 }
  0x29   :  { %61 = vadd.xlane.f32.xlu0 %v60_v3  ;;  %p297_p4 = pnand %p295_p3, %p292_p2 }
  0x2d   :  { %72 = vadd.xlane.f32.xlu0 %v71_v5 }
  0xb6   :  { %v62_v6 = vpop.xlane.xlu0 %61 }
  0xb7   :  { %v63_v7 = vrot.slane %v62_v6, 4 }
  0xb9   :  { %v64_v8 = vadd.f32 %v63_v7, %v62_v6 }
  0xba   :  { %v73_v9 = vpop.xlane.xlu0 %72 }
  0xbb   :  { %v65_v10 = vrot.slane %v64_v8, 2  ;;  %v74_v11 = vrot.slane %v73_v9, 4 }
  0xbd   :  { %v75_v12 = vadd.f32 %v74_v11, %v73_v9  ;;  %v66_v13 = vadd.f32 %v65_v10, %v64_v8 }
  0xbf   :  { %v76_v14 = vrot.slane %v75_v12, 2  ;;  %v67_v15 = vrot.slane %v66_v13, 1 }
  0xc1   :  { %v68_v16 = vadd.f32 %v67_v15, %v66_v13  ;;  %v77_v17 = vadd.f32 %v76_v14, %v75_v12 }
  0xc3   :  { %220 = vpush %v68_v16  ;;  %v78_v18 = vrot.slane %v77_v17, 1 }
  0xc5   :  { %v79_v19 = vadd.f32 %v78_v18, %v77_v17 }
  0xc7   :  { %222 = vpush %v79_v19 }
  0xf4   :  { %s221_s1 = spop %220 }
  0xf5   :  { %s351_s6 = smul.f32 0.00048828125, %s221_s1 }
  0xf7   :  { %v82_v20 = vstv %s351_s6  ;;  %s144_s10 = smul.f32 %s351_s6, %s351_s6 }
  0xf8   :  { %s223_s7 = spop %222  ;;  %v83_v24 = vsub.f32 %v56_v0, %v82_v20  ;;  %v84_v25 = vsub.f32 %v57_v1, %v82_v20 }
  0xf9   :  { %s353_s8 = smul.f32 0.00048828125, %s223_s7 }
  0xfa   :  { %v100_v32 = vmul.f32 %v83_v24, %v83_v24  ;;  %v101_v33 = vmul.f32 %v84_v25, %v84_v25  ;;  %s145_s15 = smul.f32 0.0, %s144_s10 }
  0xfb   :  { %v85_v21 = vstv %s353_s8  ;;  %s137_s9 = smul.f32 %s353_s8, %s351_s6 }
  0xfc   :  { %v86_v22 = vsub.f32 %v58_v2, %v85_v21  ;;  %v87_v23 = vsub.f32 %v59_v4, %v85_v21  ;;  %v102_v34 = vadd.f32 %v101_v33, %v100_v32  ;;  %s151_s13 = smul.f32 %s353_s8, %s353_s8 }
  0xfd   :  { %s364_s11 = smul.f32 0.0, %s137_s9 }
  0xfe   :  { %v112_v26 = vmul.f32 %v86_v22, %v86_v22  ;;  %v113_v27 = vmul.f32 %v87_v23, %v87_v23  ;;  %v88_v28 = vmul.f32 %v86_v22, %v83_v24  ;;  %v89_v29 = vmul.f32 %v87_v23, %v84_v25  ;;  %s152_s17 = smul.f32 0.0, %s151_s13 }
 0x100   :  { %v114_v30 = vadd.f32 %v113_v27, %v112_v26  ;;  %v90_v31 = vadd.f32 %v89_v29, %v88_v28 }
 0x102   :  { %115 = vadd.xlane.f32.xlu0 %v114_v30  ;;  %91 = vadd.xlane.f32.xlu1 %v90_v31 }
 0x106   :  { %103 = vadd.xlane.f32.xlu1 %v102_v34 }
 0x18f   :  { %v116_v35 = vpop.xlane.xlu0 %115  ;;  %v92_v36 = vpop.xlane.xlu1 %91 }
 0x190   :  { %v117_v37 = vrot.slane %v116_v35, 4  ;;  %v93_v38 = vrot.slane %v92_v36, 4 }
 0x192   :  { %v118_v39 = vadd.f32 %v117_v37, %v116_v35  ;;  %v94_v40 = vadd.f32 %v93_v38, %v92_v36 }
 0x193   :  { %v104_v41 = vpop.xlane.xlu1 %103 }
 0x194   :  { %v119_v42 = vrot.slane %v118_v39, 2  ;;  %v95_v43 = vrot.slane %v94_v40, 2  ;;  %v105_v44 = vrot.slane %v104_v41, 4 }
 0x196   :  { %v106_v45 = vadd.f32 %v105_v44, %v104_v41  ;;  %v96_v46 = vadd.f32 %v95_v43, %v94_v40  ;;  %v120_v47 = vadd.f32 %v119_v42, %v118_v39 }
 0x198   :  { %v107_v48 = vrot.slane %v106_v45, 2  ;;  %v97_v49 = vrot.slane %v96_v46, 1  ;;  %v121_v52 = vrot.slane %v120_v47, 1 }
 0x19a   :  { %v108_v50 = vadd.f32 %v107_v48, %v106_v45  ;;  %v98_v51 = vadd.f32 %v97_v49, %v96_v46  ;;  %v122_v55 = vadd.f32 %v121_v52, %v120_v47 }
 0x19c   :  { %224 = vpush %v98_v51  ;;  %v109_v53 = vrot.slane %v108_v50, 1 }
 0x19e   :  { %v110_v54 = vadd.f32 %v109_v53, %v108_v50 }
 0x1a0   :  { %226 = vpush %v110_v54 }
 0x1a1   :  { %228 = vpush %v122_v55 }
 0x1cd   :  { %s366_s12 = spop %224 }
 0x1ce   :  { %s139_s14 = sadd.f32 %s366_s12, %s364_s11 }
 0x1d1   :  { %s227_s16 = spop %226 }
 0x1d2   :  { %s146_s18 = sadd.f32 %s227_s16, %s145_s15  ;;  %s229_s19 = spop %228 }
 0x1d3   :  { %s153_s20 = sadd.f32 %s229_s19, %s152_s17 }
 0x1d4   :  { %v171_v56 = vstv %s146_s18 }
 0x1d5   :  { %241 = vrsqrt.f32 %v171_v56  ;;  %v181_v57 = vstv %s153_s20  ;;  %vm174_vm0 = vcmp.eq.f32.partialorder %v171_v56, inf  ;;  %v177_v61 = vand.u32 2147483648, %v171_v56 }
 0x1d6   :  { %243 = vrsqrt.f32 %v181_v57  ;;  %vm176_vm1 = vcmp.eq.f32.partialorder %v171_v56, 0.0  ;;  %vm184_vm2 = vcmp.eq.f32.partialorder %v181_v57, inf  ;;  %v187_v0 = vand.u32 2147483648, %v181_v57 }
 0x1d7   :  { %vm186_vm3 = vcmp.eq.f32.partialorder %v181_v57, 0.0 }
 0x1df   :  { %v242_v58 = vpop.eup %241 }
 0x1e0   :  { %v244_v59 = vpop.eup %243  ;;  %v173_v60 = vmul.f32 %v242_v58, %v171_v56 }
 0x1e1   :  { %v183_v62 = vmul.f32 %v244_v59, %v181_v57 }
 0x1e2   :  { %v175_v63 = vsel %vm174_vm0, %v171_v56, %v173_v60 }
 0x1e3   :  { %v178_v1 = vsel %vm176_vm1, %v177_v61, %v175_v63  ;;  %v185_v2 = vsel %vm184_vm2, %v181_v57, %v183_v62 }
 0x1e4   :  { %230 = vpush %v178_v1  ;;  %v188_v3 = vsel %vm186_vm3, %v187_v0, %v185_v2 }
 0x1e5   :  { %232 = vpush %v188_v3 }
 0x215   :  { %s231_s21 = spop %230 }
 0x216   :  { %s233_s22 = spop %232 }
 0x217   :  { %s190_s23 = smul.f32 %s233_s22, %s231_s21 }
 0x219   :  { %v191_v4 = vstv %s190_s23 }
 0x21a   :  { %245 = vrcp.f32 %v191_v4 }
 0x224   :  { %v246_v5 = vpop.eup %245 }
 0x225   :  { %234 = vpush %v246_v5 }
 0x256   :  { %s235_s24 = spop %234 }
 0x257   :  { %s194_s25 = smul.f32 %s235_s24, %s139_s14 }
 0x259   :  { %196 = sst [smem:[#allocation8]] %s194_s25 }
 0x25a   :  { %300 = shalt.err (!%p297_p4)
}
 0x25b   :  { %s311_s0 = smov [#allocation8]  }
 0x25c   :  { %204 = dma.smem_to_hbm %s311_s0, 16, %s389_s2, [#allocation5]  }
 0x25d   :  { %305 = dma.done.wait [#allocation5], 16  }
 0x25e   :  { %306 = vsyncadd [#allocation5], 4294967280 }
 0x25f   :  { %208 = sfence }
 0x260   :  { %209 = vsyncpa [#allocation4], 1 }
 0x261   :  { %210 = vsyncpa [#allocation7], 1 }
 0x262   :  { %211 = vsyncpa [#allocation5], 1 }

</bundles_post_ra>
